<compile_context>
chip_gen: v7x
topology: tpu7x:2x2x1
jax: 0.10.0
libtpu: 0.0.40
codegen_flags: <defaults>
</compile_context>

<pallas_src>
import functools

import jax
import jax.numpy as jnp
from jax.experimental import pallas as pl
from jax.experimental.pallas import tpu as pltpu


def _round_up(x, m):
    return (x + m - 1) // m * m


def _res_block_kernel(x_ref, w_ref, b_ref, o_ref):
    # x_ref: (Nb, H+2, LP)     reflect-padded rows, lane-padded (w, cin) layout (f32)
    # w_ref: (3*LP, 2*WCoutP)  banded conv weights, BN scale folded, bf16;
    #                          cols [0, WCoutP) = 3x3 branch, rest = 1x1 branch
    # b_ref: (1, 2*WCoutP)     folded BN biases (f32)
    # o_ref: (Nb, H, WCoutP)   lane-dense output tile (f32)
    nb, hp, _lp = x_ref.shape
    h = hp - 2
    wcoutp = o_ref.shape[-1]

    x = x_ref[...]                                       # (Nb, H+2, LP)
    rows = []
    for b in range(nb):                                  # static unroll over folded batch
        xi = x[b]                                        # (H+2, LP)
        # im2col over the 3 row taps; the 3 column taps and the fused 1x1 branch
        # are encoded in the banded weight, so ONE MXU matmul covers both branches.
        rows.append(jnp.concatenate([xi[dy:dy + h, :] for dy in range(3)], axis=-1))
    lhs = rows[0] if nb == 1 else jnp.concatenate(rows, axis=0)     # (Nb*H, 3*LP)

    # bf16 MXU feeds, f32 accumulation.
    y = jnp.dot(lhs.astype(jnp.bfloat16), w_ref[...],
                preferred_element_type=jnp.float32)      # (Nb*H, 2*WCoutP)
    z = y + b_ref[...]                                   # folded BN bias (f32 epilogue)
    z = jnp.where(z >= 0.0, z, 0.01 * z)                 # LeakyReLU(0.01)
    out = z[:, :wcoutp] + z[:, wcoutp:]                  # branch2 + branch1 (128-aligned split)
    o_ref[...] = out.reshape(nb, h, wcoutp).astype(o_ref.dtype)


@functools.partial(jax.jit, static_argnames=("single_buffer_params",))
def res_block_pallas(x_nchw, w3, w1, scale_bias, single_buffer_params=True):
    """x_nchw: (N, Cin, H, W) f32; w3: (3,3,Cin,Cout) HWIO; w1: (Cin,Cout);
    scale_bias: (4, Cout) = [s1, b1, s2, b2] (folded eval-mode BN, per branch)."""
    N, Cin, H, W = x_nchw.shape
    Cout = w1.shape[-1]
    assert H >= 2 and W >= 2, "reflect padding needs H >= 2 and W >= 2"
    s1, b1, s2, b2 = scale_bias

    Wp = W + 2
    seg = Wp * Cin                          # lanes of one row tap before padding
    LP = _round_up(seg, 128)                # lane-aligned per-tap segment
    Kp = 3 * LP
    WCout = W * Cout
    WCoutP = _round_up(WCout, 128)          # lane-dense output width

    # --- Tiling: TH == H (reflection handled in-tile, no halo streams). Fold batch
    # into the matmul M dim up to ~128 rows, keeping >= 2 even grid steps when the
    # batch allows (one per v7x TensorCore).
    Nb = 1
    for cand in range(2, N + 1):
        if N % cand == 0 and cand * H <= 128 and N // cand >= 2:
            Nb = cand
    steps = N // Nb

    # Rough per-step VMEM: double-buffered input/output, weight/bias x1 (or x2),
    # generous factor for in-kernel temporaries.
    vmem_need = (2 * Nb * (H + 2) * LP * 4 + 2 * Nb * H * WCoutP * 4
                 + (1 if single_buffer_params else 2) * (Kp * 2 * WCoutP * 2 + 2 * WCoutP * 4)
                 + 4 * Nb * H * (3 * LP * 2 + 2 * WCoutP * 4))
    assert vmem_need < 24 * 1024 * 1024, "tile too large for scoped VMEM; split H (TODO)"

    # --- Input relayout: NCHW -> NHWC, reflect-pad H and W by 1, flatten (w, cin)
    # into lanes and zero-pad to LP. Fuses into a single XLA copy.
    x_nhwc = jnp.transpose(x_nchw, (0, 2, 3, 1))
    x_pad = jnp.pad(x_nhwc, ((0, 0), (1, 1), (1, 1), (0, 0)), mode="reflect")
    x_flat = x_pad.reshape(N, H + 2, seg)
    if LP > seg:
        x_flat = jnp.pad(x_flat, ((0, 0), (0, 0), (0, LP - seg)))

    # --- Banded weight (BN scale folded), zero-padded to (Kp, 2*WCoutP), bf16.
    # Row index = dy*LP + wp*Cin + cin ; col index = branch*WCoutP + w*Cout + cout.
    w3s = (w3 * s2).astype(jnp.float32)                   # (3,3,Cin,Cout)
    w1s = (w1 * s1).astype(jnp.float32)                   # (Cin,Cout)
    big2 = jnp.zeros((3, Wp, Cin, W, Cout), jnp.float32)
    for dx in range(3):
        shift = jnp.eye(W, Wp, k=dx, dtype=jnp.float32)   # [w, w+dx] = 1
        big2 = big2 + jnp.einsum("wp,dio->dpiwo", shift, w3s[:, dx])
    shift1 = jnp.eye(W, Wp, k=1, dtype=jnp.float32)       # 1x1 -> center column tap
    big1 = jnp.zeros((3, Wp, Cin, W, Cout), jnp.float32).at[1].set(
        jnp.einsum("wp,io->piwo", shift1, w1s))

    def _pad_band(band):                                  # -> (Kp, WCoutP)
        band = band.reshape(3, seg, WCout)
        band = jnp.pad(band, ((0, 0), (0, LP - seg), (0, WCoutP - WCout)))
        return band.reshape(Kp, WCoutP)

    wcat = jnp.concatenate([_pad_band(big2), _pad_band(big1)],
                           axis=-1).astype(jnp.bfloat16)  # (Kp, 2*WCoutP)
    bcat = jnp.concatenate(
        [jnp.pad(jnp.tile(b2, W), (0, WCoutP - WCout)),
         jnp.pad(jnp.tile(b1, W), (0, WCoutP - WCout))]).reshape(1, 2 * WCoutP)
    bcat = bcat.astype(jnp.float32)

    # Grid-invariant weight/bias blocks: single-buffered.
    param_mode = {"pipeline_mode": pl.Buffered(1)} if single_buffer_params else {}

    cost = pl.CostEstimate(
        flops=2 * N * H * W * Cout * Cin * 10,            # 3x3 (9 taps) + 1x1 branch
        transcendentals=0,
        bytes_accessed=(4 * N * (H + 2) * LP + 4 * N * H * WCoutP
                        + 2 * Kp * 2 * WCoutP + 4 * 2 * WCoutP),
    )

    out_flat = pl.pallas_call(
        _res_block_kernel,
        out_shape=jax.ShapeDtypeStruct((N, H, WCoutP), jnp.float32),
        grid_spec=pltpu.PrefetchScalarGridSpec(
            num_scalar_prefetch=0,
            grid=(steps,),
            in_specs=[
                pl.BlockSpec((Nb, H + 2, LP), lambda n: (n, 0, 0)),
                pl.BlockSpec((Kp, 2 * WCoutP), lambda n: (0, 0), **param_mode),
                pl.BlockSpec((1, 2 * WCoutP), lambda n: (0, 0), **param_mode),
            ],
            out_specs=pl.BlockSpec((Nb, H, WCoutP), lambda n: (n, 0, 0)),
        ),
        compiler_params=pltpu.CompilerParams(
            dimension_semantics=("parallel",),
            vmem_limit_bytes=32 * 1024 * 1024),
        cost_estimate=cost,
    )(x_flat, wcat, bcat)

    # (N, H, WCoutP) -> strip lane padding -> (N, H, W, Cout) -> NCHW.
    out = out_flat[:, :, :WCout].reshape(N, H, W, Cout)
    return jnp.transpose(out, (0, 3, 1, 2))


def _reference(x_nchw, w3, w1, scale_bias):
    """Pure-JAX f32 reference (same eval-mode semantics)."""
    x = jnp.transpose(x_nchw, (0, 2, 3, 1))
    xp = jnp.pad(x, ((0, 0), (1, 1), (1, 1), (0, 0)), mode="reflect")
    conv3 = jax.lax.conv_general_dilated(
        xp, w3, window_strides=(1, 1), padding="VALID",
        dimension_numbers=("NHWC", "HWIO", "NHWC"))
    conv1 = jnp.einsum("nhwc,co->nhwo", x, w1)
    s1, b1, s2, b2 = scale_bias
    y2 = conv3 * s2 + b2
    y2 = jnp.where(y2 >= 0, y2, 0.01 * y2)
    y1 = conv1 * s1 + b1
    y1 = jnp.where(y1 >= 0, y1, 0.01 * y1)
    return jnp.transpose(y2 + y1, (0, 3, 1, 2))


if __name__ == "__main__":
    key = jax.random.PRNGKey(0)
    N, Cin, Cout, H, W = 2, 4, 8, 16, 16

    k_x, k_w3, k_w1 = jax.random.split(key, 3)
    x = jax.random.normal(k_x, (N, Cin, H, W), dtype=jnp.float32)

    # Conv weights (deterministic); HWIO layout for JAX-style convs.
    w3 = 0.1 * jax.random.normal(k_w3, (3, 3, Cin, Cout), dtype=jnp.float32)
    w1 = 0.1 * jax.random.normal(k_w1, (Cin, Cout), dtype=jnp.float32)

    # Fold BatchNorm (fresh-module eval defaults) into per-channel scale/bias.
    eps = 1e-5
    gamma = jnp.ones((Cout,), jnp.float32)
    beta = jnp.zeros((Cout,), jnp.float32)
    run_mean = jnp.zeros((Cout,), jnp.float32)
    run_var = jnp.ones((Cout,), jnp.float32)
    scale = gamma / jnp.sqrt(run_var + eps)
    bias = beta - run_mean * scale
    scale_bias = jnp.stack([scale, bias, scale, bias], axis=0)  # [s1, b1, s2, b2]

    try:
        out = res_block_pallas(x, w3, w1, scale_bias, single_buffer_params=True)
        jax.block_until_ready(out)
    except Exception:  # pragma: no cover — fallback if Buffered(1) is unsupported
        out = res_block_pallas(x, w3, w1, scale_bias, single_buffer_params=False)
        jax.block_until_ready(out)

    ref = _reference(x, w3, w1, scale_bias)
    assert out.shape == (N, Cout, H, W)
    # bf16 MXU feeds with f32 accumulation: compare against the f32 reference at a
    # bf16-level tolerance (observed max |err| is a few 1e-3 at these scales).
    assert jnp.allclose(out, ref, atol=2e-2, rtol=2e-2)

    print("KERNEL_OK")
</pallas_src>

<mosaic_0001>
module attributes {stable_mosaic.version = 11 : i64} {
  func.func @_res_block_kernel(%arg0: i32, %arg1: memref<1x18x128xf32, #tpu.memory_space<vmem>>, %arg2: memref<384x256xbf16, #tpu.memory_space<vmem>>, %arg3: memref<1x256xf32, #tpu.memory_space<vmem>>, %arg4: memref<1x16x128xf32, #tpu.memory_space<vmem>>) attributes {dimension_semantics = [#tpu.dimension_semantics<parallel>], iteration_bounds = array<i64: 2>, scalar_prefetch = 0 : i64, scratch_operands = 0 : i64, tpu.core_type = #tpu.core_type<tc>, window_params = [{transform_indices = @transform_0, window_bounds = array<i64: 1, 18, 128>}, {pipeline_mode = #tpu.pipeline_mode<synchronous>, transform_indices = @transform_1, window_bounds = array<i64: 384, 256>}, {pipeline_mode = #tpu.pipeline_mode<synchronous>, transform_indices = @transform_2, window_bounds = array<i64: 1, 256>}, {transform_indices = @transform_3, window_bounds = array<i64: 1, 16, 128>}]} {
    %c0 = arith.constant 0 : index
    %c0_0 = arith.constant 0 : index
    %c0_1 = arith.constant 0 : index
    %0 = vector.load %arg1[%c0, %c0_0, %c0_1] : memref<1x18x128xf32, #tpu.memory_space<vmem>>, vector<1x18x128xf32>
    %1 = vector.shape_cast %0 : vector<1x18x128xf32> to vector<18x128xf32>
    %2 = vector.extract_strided_slice %1 {offsets = [0, 0], sizes = [16, 128], strides = [1, 1]} : vector<18x128xf32> to vector<16x128xf32>
    %3 = vector.extract_strided_slice %1 {offsets = [1, 0], sizes = [16, 128], strides = [1, 1]} : vector<18x128xf32> to vector<16x128xf32>
    %4 = vector.extract_strided_slice %1 {offsets = [2, 0], sizes = [16, 128], strides = [1, 1]} : vector<18x128xf32> to vector<16x128xf32>
    %5 = tpu.concatenate %2, %3, %4 in 1 : vector<16x128xf32>, vector<16x128xf32>, vector<16x128xf32> -> vector<16x384xf32>
    %6 = arith.truncf %5 : vector<16x384xf32> to vector<16x384xbf16>
    %c0_2 = arith.constant 0 : index
    %c0_3 = arith.constant 0 : index
    %7 = vector.load %arg2[%c0_2, %c0_3] : memref<384x256xbf16, #tpu.memory_space<vmem>>, vector<384x256xbf16>
    %cst = arith.constant dense<0.000000e+00> : vector<16x256xf32>
    %8 = tpu.matmul %6, %7, %cst {dimension_numbers = #tpu.dot_dimension_numbers<[1], [0], [0], [1], [0, 0, 1, 1], [], []>} : vector<16x384xbf16>, vector<384x256xbf16>, vector<16x256xf32> -> vector<16x256xf32>
    %c0_4 = arith.constant 0 : index
    %c0_5 = arith.constant 0 : index
    %9 = vector.load %arg3[%c0_4, %c0_5] : memref<1x256xf32, #tpu.memory_space<vmem>>, vector<1x256xf32>
    %10 = vector.broadcast %9 : vector<1x256xf32> to vector<16x256xf32>
    %11 = arith.addf %8, %10 : vector<16x256xf32>
    %cst_6 = arith.constant 0.000000e+00 : f32
    %12 = vector.broadcast %cst_6 : f32 to vector<16x256xf32>
    %13 = arith.cmpf oge, %11, %12 : vector<16x256xf32>
    %cst_7 = arith.constant 0.00999999977 : f32
    %14 = vector.broadcast %cst_7 : f32 to vector<16x256xf32>
    %15 = arith.mulf %14, %11 : vector<16x256xf32>
    %16 = arith.select %13, %11, %15 : vector<16x256xi1>, vector<16x256xf32>
    %17 = vector.extract_strided_slice %16 {offsets = [0, 0], sizes = [16, 128], strides = [1, 1]} : vector<16x256xf32> to vector<16x128xf32>
    %18 = vector.extract_strided_slice %16 {offsets = [0, 128], sizes = [16, 128], strides = [1, 1]} : vector<16x256xf32> to vector<16x128xf32>
    %19 = arith.addf %17, %18 : vector<16x128xf32>
    %20 = vector.shape_cast %19 : vector<16x128xf32> to vector<1x16x128xf32>
    %c0_8 = arith.constant 0 : index
    %c0_9 = arith.constant 0 : index
    %c0_10 = arith.constant 0 : index
    %21 = vector.load %arg4[%c0_8, %c0_9, %c0_10] : memref<1x16x128xf32, #tpu.memory_space<vmem>>, vector<1x16x128xf32>
    tpu.vector_store %arg4[%c0_8, %c0_9, %c0_10], %20 {strides = array<i32>} : memref<1x16x128xf32, #tpu.memory_space<vmem>>, vector<1x16x128xf32>,
    return
  }
  func.func @transform_0(%arg0: i32) -> (i32, i32, i32) {
    %c0_i32 = arith.constant 0 : i32
    %c0_i32_0 = arith.constant 0 : i32
    %c0_i32_1 = arith.constant 0 : i32
    return %arg0, %c0_i32, %c0_i32_0 : i32, i32, i32
  }
  func.func @transform_1(%arg0: i32) -> (i32, i32) {
    %c0_i32 = arith.constant 0 : i32
    %c0_i32_0 = arith.constant 0 : i32
    %c0_i32_1 = arith.constant 0 : i32
    return %c0_i32, %c0_i32_0 : i32, i32
  }
  func.func @transform_2(%arg0: i32) -> (i32, i32) {
    %c0_i32 = arith.constant 0 : i32
    %c0_i32_0 = arith.constant 0 : i32
    %c0_i32_1 = arith.constant 0 : i32
    return %c0_i32, %c0_i32_0 : i32, i32
  }
  func.func @transform_3(%arg0: i32) -> (i32, i32, i32) {
    %c0_i32 = arith.constant 0 : i32
    %c0_i32_0 = arith.constant 0 : i32
    %c0_i32_1 = arith.constant 0 : i32
    return %arg0, %c0_i32, %c0_i32_0 : i32, i32, i32
  }
}

module attributes {stable_mosaic.version = 11 : i64} {
  func.func @_res_block_kernel(%arg0: i32, %arg1: memref<1x18x128xf32, #tpu.memory_space<vmem>>, %arg2: memref<384x256xbf16, #tpu.memory_space<vmem>>, %arg3: memref<1x256xf32, #tpu.memory_space<vmem>>, %arg4: memref<1x16x128xf32, #tpu.memory_space<vmem>>) attributes {dimension_semantics = [#tpu.dimension_semantics<parallel>], iteration_bounds = array<i64: 2>, scalar_prefetch = 0 : i64, scratch_operands = 0 : i64, tpu.core_type = #tpu.core_type<tc>, window_params = [{transform_indices = @transform_0, window_bounds = array<i64: 1, 18, 128>}, {pipeline_mode = #tpu.pipeline_mode<synchronous>, transform_indices = @transform_1, window_bounds = array<i64: 384, 256>}, {pipeline_mode = #tpu.pipeline_mode<synchronous>, transform_indices = @transform_2, window_bounds = array<i64: 1, 256>}, {transform_indices = @transform_3, window_bounds = array<i64: 1, 16, 128>}]} {
    %c0 = arith.constant 0 : index
    %c0_0 = arith.constant 0 : index
    %c0_1 = arith.constant 0 : index
    %0 = vector.load %arg1[%c0, %c0_0, %c0_1] : memref<1x18x128xf32, #tpu.memory_space<vmem>>, vector<1x18x128xf32>
    %1 = vector.shape_cast %0 : vector<1x18x128xf32> to vector<18x128xf32>
    %2 = vector.extract_strided_slice %1 {offsets = [0, 0], sizes = [16, 128], strides = [1, 1]} : vector<18x128xf32> to vector<16x128xf32>
    %3 = vector.extract_strided_slice %1 {offsets = [1, 0], sizes = [16, 128], strides = [1, 1]} : vector<18x128xf32> to vector<16x128xf32>
    %4 = vector.extract_strided_slice %1 {offsets = [2, 0], sizes = [16, 128], strides = [1, 1]} : vector<18x128xf32> to vector<16x128xf32>
    %5 = tpu.concatenate %2, %3, %4 in 1 : vector<16x128xf32>, vector<16x128xf32>, vector<16x128xf32> -> vector<16x384xf32>
    %6 = arith.truncf %5 : vector<16x384xf32> to vector<16x384xbf16>
    %c0_2 = arith.constant 0 : index
    %c0_3 = arith.constant 0 : index
    %7 = vector.load %arg2[%c0_2, %c0_3] : memref<384x256xbf16, #tpu.memory_space<vmem>>, vector<384x256xbf16>
    %cst = arith.constant dense<0.000000e+00> : vector<16x256xf32>
    %8 = tpu.matmul %6, %7, %cst {dimension_numbers = #tpu.dot_dimension_numbers<[1], [0], [0], [1], [0, 0, 1, 1], [], []>} : vector<16x384xbf16>, vector<384x256xbf16>, vector<16x256xf32> -> vector<16x256xf32>
    %c0_4 = arith.constant 0 : index
    %c0_5 = arith.constant 0 : index
    %9 = vector.load %arg3[%c0_4, %c0_5] : memref<1x256xf32, #tpu.memory_space<vmem>>, vector<1x256xf32>
    %10 = vector.broadcast %9 : vector<1x256xf32> to vector<16x256xf32>
    %11 = arith.addf %8, %10 : vector<16x256xf32>
    %cst_6 = arith.constant 0.000000e+00 : f32
    %12 = vector.broadcast %cst_6 : f32 to vector<16x256xf32>
    %13 = arith.cmpf oge, %11, %12 : vector<16x256xf32>
    %cst_7 = arith.constant 0.00999999977 : f32
    %14 = vector.broadcast %cst_7 : f32 to vector<16x256xf32>
    %15 = arith.mulf %14, %11 : vector<16x256xf32>
    %16 = arith.select %13, %11, %15 : vector<16x256xi1>, vector<16x256xf32>
    %17 = vector.extract_strided_slice %16 {offsets = [0, 0], sizes = [16, 128], strides = [1, 1]} : vector<16x256xf32> to vector<16x128xf32>
    %18 = vector.extract_strided_slice %16 {offsets = [0, 128], sizes = [16, 128], strides = [1, 1]} : vector<16x256xf32> to vector<16x128xf32>
    %19 = arith.addf %17, %18 : vector<16x128xf32>
    %20 = vector.shape_cast %19 : vector<16x128xf32> to vector<1x16x128xf32>
    %c0_8 = arith.constant 0 : index
    %c0_9 = arith.constant 0 : index
    %c0_10 = arith.constant 0 : index
    %21 = vector.load %arg4[%c0_8, %c0_9, %c0_10] : memref<1x16x128xf32, #tpu.memory_space<vmem>>, vector<1x16x128xf32>
    tpu.vector_store %arg4[%c0_8, %c0_9, %c0_10], %20 {strides = array<i32>} : memref<1x16x128xf32, #tpu.memory_space<vmem>>, vector<1x16x128xf32>,
    return
  }
  func.func @transform_0(%arg0: i32) -> (i32, i32, i32) {
    %c0_i32 = arith.constant 0 : i32
    %c0_i32_0 = arith.constant 0 : i32
    %c0_i32_1 = arith.constant 0 : i32
    return %arg0, %c0_i32, %c0_i32_0 : i32, i32, i32
  }
  func.func @transform_1(%arg0: i32) -> (i32, i32) {
    %c0_i32 = arith.constant 0 : i32
    %c0_i32_0 = arith.constant 0 : i32
    %c0_i32_1 = arith.constant 0 : i32
    return %c0_i32, %c0_i32_0 : i32, i32
  }
  func.func @transform_2(%arg0: i32) -> (i32, i32) {
    %c0_i32 = arith.constant 0 : i32
    %c0_i32_0 = arith.constant 0 : i32
    %c0_i32_1 = arith.constant 0 : i32
    return %c0_i32, %c0_i32_0 : i32, i32
  }
  func.func @transform_3(%arg0: i32) -> (i32, i32, i32) {
    %c0_i32 = arith.constant 0 : i32
    %c0_i32_0 = arith.constant 0 : i32
    %c0_i32_1 = arith.constant 0 : i32
    return %arg0, %c0_i32, %c0_i32_0 : i32, i32, i32
  }
}

</mosaic_0001>

<bundles_post_ra>
// kernel: tile.14
= control target key start
LH: loop header
LB: loop body
LE: loop exit
PB: predicated region body
PF: predicated region fallthrough
CT: control target
= control target key end

     0   :  { %s28_s0 = inlined_call_operand.vmem [shape: f32[8], index: 0, kind: input, shape index: {}]   ;;  %s29_s1 = inlined_call_operand.vmem [shape: f32[16,8], index: 1, kind: output, shape index: {}]  }
   0x1   :  { %v4_v0 = vld [vmem:[%s28_s0] ss:$0 sm:$0xff] }
   0x2   :  { %5 = vst [vmem:[%s29_s1] sm:$0xff] %v4_v0  ;;  %8 = vst [vmem:[%s29_s1 + $0x8] sm:$0xff] %v4_v0 }

// kernel: tile.15
= control target key start
LH: loop header
LB: loop body
LE: loop exit
PB: predicated region body
PF: predicated region fallthrough
CT: control target
= control target key end

     0   :  { %s131_s10 = smov 120   ;;  %s132_s11 = smov 104   ;;  %vm3_vm0 = vcmask 64512   ;;  %vm9_vm1 = vcmask 1048512   ;;  %vm15_vm2 = vcmask 982912   ;;  %vm21_vm3 = vcmask 917312   ;;  %s207_s0 = inlined_call_operand.vmem [shape: f32[16,8], index: 0, kind: input, shape index: {}]   ;;  %s208_s1 = inlined_call_operand.vmem [shape: f32[128], index: 1, kind: output, shape index: {}]  }
   0x1   :  { %v101_v0 = vld [vmem:[%s207_s0 + $0xf] sm:$0x1]   ;;  %v103_v1 = vld [vmem:[%s207_s0 + $0xd] sm:$0x1]   ;;  %v102_v2 = vld [vmem:[%s207_s0 + $0xe] sm:$0x1]  }
   0x2   :  { %7 = vrot.lane.b32.xlu0 %v101_v0, %s131_s10  ;;  %19 = vrot.lane.b32.xlu1 %v103_v1, %s132_s11  ;;  %v104_v3 = vld [vmem:[%s207_s0 + $0xc] sm:$0x1]   ;;  %s133_s16 = smov 112   ;;  %s134_s17 = smov 96   ;;  %v105_v4 = vld [vmem:[%s207_s0 + $0xb] sm:$0x1]  }
   0x3   :  { %v106_v5 = vld [vmem:[%s207_s0 + $0xa] sm:$0x1]   ;;  %v2_v6 = vld [vmem:[%s207_s0] sm:$0x1]   ;;  %s135_s24 = smov 88   ;;  %s136_s25 = smov 80  }
   0x4   :  { %4 = vst.msk [vmem:[#allocation0] sm:$0x1] %vm3_vm0, %v2_v6   ;;  %v107_v7 = vld [vmem:[%s207_s0 + $0x9] sm:$0x1]   ;;  %v108_v8 = vld [vmem:[%s207_s0 + $0x8] sm:$0x1]  }
   0x5   :  { %s137_s30 = smov 72   ;;  %s138_s2 = smov 64   ;;  %v109_v9 = vld [vmem:[%s207_s0 + $0x7] sm:$0x1]   ;;  %v110_v10 = vld [vmem:[%s207_s0 + $0x6] sm:$0x1]  }
   0x6   :  { %13 = vrot.lane.b32.xlu0 %v102_v2, %s133_s16  ;;  %25 = vrot.lane.b32.xlu1 %v104_v3, %s134_s17  ;;  %s139_s7 = smov 56   ;;  %s140_s8 = smov 48   ;;  %v111_v11 = vld [vmem:[%s207_s0 + $0x5] sm:$0x1]   ;;  %v112_v12 = vld [vmem:[%s207_s0 + $0x4] sm:$0x1]  }
   0x7   :  { %s141_s13 = smov 40   ;;  %s142_s14 = smov 32   ;;  %v113_v13 = vld [vmem:[%s207_s0 + $0x3] sm:$0x1]   ;;  %v114_v14 = vld [vmem:[%s207_s0 + $0x2] sm:$0x1]  }
   0x8   :  { %s143_s19 = smov 24   ;;  %s144_s20 = smov 16   ;;  %v115_v15 = vld [vmem:[%s207_s0 + $0x1] sm:$0x1]   ;;  %vm27_vm4 = vcmask 851712   ;;  %vm33_vm5 = vcmask 786112  }
   0x9   :  { %s145_s0 = smov 8   ;;  %vm39_vm6 = vcmask 720512   ;;  %vm45_vm7 = vcmask 654912   ;;  %vm51_vm8 = vcmask 589312   ;;  %vm57_vm9 = vcmask 523712  }
   0xa   :  { %31 = vrot.lane.b32.xlu0 %v105_v4, %s135_s24  ;;  %37 = vrot.lane.b32.xlu1 %v106_v5, %s136_s25  ;;  %vm63_vm10 = vcmask 458112   ;;  %vm69_vm11 = vcmask 392512   ;;  %vm75_vm12 = vcmask 326912   ;;  %vm81_vm13 = vcmask 261312  }
   0xb   :  { %vm87_vm14 = vcmask 195712   ;;  %vm93_vm15 = vcmask 130112  }
   0xe   :  { %43 = vrot.lane.b32.xlu0 %v107_v7, %s137_s30  ;;  %49 = vrot.lane.b32.xlu1 %v108_v8, %s138_s2 }
  0x12   :  { %55 = vrot.lane.b32.xlu0 %v109_v9, %s139_s7  ;;  %61 = vrot.lane.b32.xlu1 %v110_v10, %s140_s8 }
  0x16   :  { %67 = vrot.lane.b32.xlu0 %v111_v11, %s141_s13  ;;  %73 = vrot.lane.b32.xlu1 %v112_v12, %s142_s14 }
  0x1a   :  { %79 = vrot.lane.b32.xlu0 %v113_v13, %s143_s19  ;;  %85 = vrot.lane.b32.xlu1 %v114_v14, %s144_s20 }
  0x1e   :  { %91 = vrot.lane.b32.xlu0 %v115_v15, %s145_s0 }
  0x74   :  { %v8_v16 = vpop.permute.xlu0 %7   ;;  %v20_v17 = vpop.permute.xlu1 %19  }
  0x75   :  { %10 = vst.msk [vmem:[#allocation0] sm:$0x1] %vm9_vm1, %v8_v16  }
  0x78   :  { %v14_v18 = vpop.permute.xlu0 %13   ;;  %v26_v19 = vpop.permute.xlu1 %25  }
  0x79   :  { %16 = vst.msk [vmem:[#allocation0] sm:$0x1] %vm15_vm2, %v14_v18  }
  0x7a   :  { %22 = vst.msk [vmem:[#allocation0] sm:$0x1] %vm21_vm3, %v20_v17  }
  0x7b   :  { %28 = vst.msk [vmem:[#allocation0] sm:$0x1] %vm27_vm4, %v26_v19  }
  0x7c   :  { %v32_v20 = vpop.permute.xlu0 %31   ;;  %v38_v21 = vpop.permute.xlu1 %37  }
  0x7d   :  { %34 = vst.msk [vmem:[#allocation0] sm:$0x1] %vm33_vm5, %v32_v20  }
  0x7e   :  { %40 = vst.msk [vmem:[#allocation0] sm:$0x1] %vm39_vm6, %v38_v21  }
  0x80   :  { %v44_v22 = vpop.permute.xlu0 %43   ;;  %v50_v23 = vpop.permute.xlu1 %49  }
  0x81   :  { %46 = vst.msk [vmem:[#allocation0] sm:$0x1] %vm45_vm7, %v44_v22  }
  0x82   :  { %52 = vst.msk [vmem:[#allocation0] sm:$0x1] %vm51_vm8, %v50_v23  }
  0x84   :  { %v56_v24 = vpop.permute.xlu0 %55   ;;  %v62_v25 = vpop.permute.xlu1 %61  }
  0x85   :  { %58 = vst.msk [vmem:[#allocation0] sm:$0x1] %vm57_vm9, %v56_v24  }
  0x86   :  { %64 = vst.msk [vmem:[#allocation0] sm:$0x1] %vm63_vm10, %v62_v25  }
  0x88   :  { %v68_v26 = vpop.permute.xlu0 %67   ;;  %v74_v27 = vpop.permute.xlu1 %73  }
  0x89   :  { %70 = vst.msk [vmem:[#allocation0] sm:$0x1] %vm69_vm11, %v68_v26  }
  0x8a   :  { %76 = vst.msk [vmem:[#allocation0] sm:$0x1] %vm75_vm12, %v74_v27  }
  0x8c   :  { %v80_v28 = vpop.permute.xlu0 %79   ;;  %v86_v29 = vpop.permute.xlu1 %85  }
  0x8d   :  { %82 = vst.msk [vmem:[#allocation0] sm:$0x1] %vm81_vm13, %v80_v28  }
  0x8e   :  { %88 = vst.msk [vmem:[#allocation0] sm:$0x1] %vm87_vm14, %v86_v29  }
  0x90   :  { %v92_v30 = vpop.permute.xlu0 %91  }
  0x91   :  { %94 = vst.msk [vmem:[#allocation0] sm:$0x1] %vm93_vm15, %v92_v30  }
  0x98   :  { %v98_v31 = vld [vmem:[#allocation0] sm:$0x1] }
  0x99   :  { %100 = vst [vmem:[%s208_s1] sm:$0x1] %v98_v31 }

// kernel: res_block_pallas.1
= control target key start
LH: loop header
LB: loop body
LE: loop exit
PB: predicated region body
PF: predicated region fallthrough
CT: control target
= control target key end

     0   :  { %s832_s12 = smov 0   ;;  %s1004_s0 = inlined_call_operand.vmem [shape: f32[2,18,128], index: 0, kind: input, shape index: {}]   ;;  %s1005_s1 = inlined_call_operand.vmem [shape: bf16[384,256], index: 1, kind: input, shape index: {}]   ;;  %s1006_s2 = inlined_call_operand.vmem [shape: f32[1,256], index: 2, kind: input, shape index: {}]   ;;  %s1007_s3 = inlined_call_operand.vmem [shape: f32[2,16,128], index: 3, kind: output, shape index: {}]  }
   0x1 LB: > { %s654_s13 = sadd.s32 4294967295, %s809_s12   ;;  %p658_p0 = scmp.ge.s32.totalorder %s809_s12, 1  ;;  %s809_s12 = sphi %s832_s12, %s13_s12  }
   0x2   : > { %p137_p1 = scmp.lt.s32.totalorder %s809_s12, 3 }
   0x4   : > { %p138_p2 = pnand %p658_p0, %p137_p1 }
   0x5   : > { %v731_v0 = vld [vmem:[%s1005_s1 + $0x4] ss:$8 sps:$4 sm:$0xff] (!%p138_p2)   ;;  %v733_v1 = vld [vmem:[%s1005_s1] ss:$8 sps:$4 sm:$0xff] (!%p138_p2)   ;;  %v811_v2 = vmov (!%p138_p2), 0   ;;  %p161_p3 = scmp.lt.s32.totalorder (!%p138_p2), %s654_s13, 1 }
   0x6   : > { %141 = sbr.rel (%p138_p2) target bundleno = 295 (0x127), region = 32  ;;  %572 = vmatprep.mubr.bf16.mxu0 (!%p138_p2), %v811_v2  ;;  %497 = vmatprep.subr.bf16.mxu1 (!%p138_p2), %v731_v0  ;;  %v734_v3 = vld [vmem:[%s1005_s1 + $0x14] ss:$8 sps:$4 sm:$0xff] (!%p138_p2)   ;;  %v736_v4 = vld [vmem:[%s1005_s1 + $0x10] ss:$8 sps:$4 sm:$0xff] (!%p138_p2)   ;;  %vm178_vm0 = vcmask (!%p138_p2), 1046528  }
   0x7   : > { %498 = vmatpush1.bf16.msra.mxu1 (!%p138_p2), %v733_v1  ;;  %v737_v5 = vld [vmem:[%s1005_s1 + $0x24] ss:$8 sps:$4 sm:$0xff] (!%p138_p2)   ;;  %v739_v6 = vld [vmem:[%s1005_s1 + $0x20] ss:$8 sps:$4 sm:$0xff] (!%p138_p2)   ;;  %v740_v7 = vld [vmem:[%s1005_s1 + $0x34] ss:$8 sps:$4 sm:$0xff] (!%p138_p2)  }
   0x8   : > { %499 = vmatprep.subr.bf16.mxu1 (!%p138_p2), %v734_v3  ;;  %v742_v8 = vld [vmem:[%s1005_s1 + $0x30] ss:$8 sps:$4 sm:$0xff] (!%p138_p2)   ;;  %v755_v9 = vld [vmem:[%s1005_s1 + $0x104] ss:$8 sps:$4 sm:$0xff] (!%p138_p2)   ;;  %v759_v11 = vld [vmem:[%s1005_s1 + $0x100] ss:$8 sps:$4 sm:$0xff] (!%p138_p2)  }
   0x9   : > { %v743_v10 = vld [vmem:[%s1005_s1 + $0x44] ss:$8 sps:$4 sm:$0xff] (!%p138_p2)   ;;  %540 = vmatprep.subr.bf16.mxu0 (!%p138_p2), %v755_v9  ;;  %v761_v12 = vld [vmem:[%s1005_s1 + $0x114] ss:$8 sps:$4 sm:$0xff] (!%p138_p2)   ;;  %v745_v13 = vld [vmem:[%s1005_s1 + $0x40] ss:$8 sps:$4 sm:$0xff] (!%p138_p2)  }
   0xa   : > { %541 = vmatpush1.bf16.msra.mxu0 (!%p138_p2), %v759_v11  ;;  %v746_v14 = vld [vmem:[%s1005_s1 + $0x54] ss:$8 sps:$4 sm:$0xff] (!%p138_p2)   ;;  %v765_v15 = vld [vmem:[%s1005_s1 + $0x110] ss:$8 sps:$4 sm:$0xff] (!%p138_p2)   ;;  %v767_v16 = vld [vmem:[%s1005_s1 + $0x124] ss:$8 sps:$4 sm:$0xff] (!%p138_p2)  }
   0xb   : > { %500 = vmatpush1.bf16.msra.mxu1 (!%p138_p2), %v736_v4  ;;  %542 = vmatprep.subr.bf16.mxu0 (!%p138_p2), %v761_v12  ;;  %v748_v17 = vld [vmem:[%s1005_s1 + $0x50] ss:$8 sps:$4 sm:$0xff] (!%p138_p2)   ;;  %v771_v18 = vld [vmem:[%s1005_s1 + $0x120] ss:$8 sps:$4 sm:$0xff] (!%p138_p2)   ;;  %v773_v19 = vld [vmem:[%s1005_s1 + $0x134] ss:$8 sps:$4 sm:$0xff] (!%p138_p2)  }
   0xc   : > { %501 = vmatprep.subr.bf16.mxu1 (!%p138_p2), %v737_v5  ;;  %v749_v20 = vld [vmem:[%s1005_s1 + $0x64] ss:$8 sps:$4 sm:$0xff] (!%p138_p2)   ;;  %v777_v21 = vld [vmem:[%s1005_s1 + $0x130] ss:$8 sps:$4 sm:$0xff] (!%p138_p2)   ;;  %v751_v22 = vld [vmem:[%s1005_s1 + $0x60] ss:$8 sps:$4 sm:$0xff] (!%p138_p2)   ;;  %v247_v5 = vlaneseq (!%p138_p2) }
   0xd   : > { %s1009_s13 = smov (!%p161_p3, %s654_s13), 1  ;;  %v779_v23 = vld [vmem:[%s1005_s1 + $0x144] ss:$8 sps:$4 sm:$0xff]   ;;  %v752_v24 = vld [vmem:[%s1005_s1 + $0x74] ss:$8 sps:$4 sm:$0xff]   ;;  %vm186_vm1 = vcmask 1045504  }
   0xe   : > { %543 = vmatpush1.bf16.msra.mxu0 %v765_v15  ;;  %s721_s10 = smul.u32 24, %s1009_s13  ;;  %v754_v25 = vld [vmem:[%s1005_s1 + $0x70] ss:$8 sps:$4 sm:$0xff]   ;;  %v783_v26 = vld [vmem:[%s1005_s1 + $0x140] ss:$8 sps:$4 sm:$0xff]   ;;  %s712_s16 = sshll.u32 %s1009_s13, 4 }
   0xf   : > { %502 = vmatpush1.bf16.msra.mxu1 %v739_v6  ;;  %544 = vmatprep.subr.bf16.mxu0 %v767_v16  ;;  %v785_v27 = vld [vmem:[%s1005_s1 + $0x154] ss:$8 sps:$4 sm:$0xff]   ;;  %v757_v28 = vld [vmem:[%s1005_s1 + $0x84] ss:$8 sps:$4 sm:$0xff]   ;;  %v789_v29 = vld [vmem:[%s1005_s1 + $0x150] ss:$8 sps:$4 sm:$0xff]   ;;  %s170_s19 = scalar_lea.vmem %s1007_s3, %s712_s16 }
  0x10   : > { %503 = vmatprep.subr.bf16.mxu1 %v740_v7  ;;  %s165_s23 = scalar_lea.vmem %s1004_s0, %s721_s10  ;;  %v760_v30 = vld [vmem:[%s1005_s1 + $0x80] ss:$8 sps:$4 sm:$0xff]   ;;  %v763_v31 = vld [vmem:[%s1005_s1 + $0x94] ss:$8 sps:$4 sm:$0xff]   ;;  %v791_v32 = vld [vmem:[%s1005_s1 + $0x164] ss:$8 sps:$4 sm:$0xff]  }
  0x11   : > { %v172_v33 = vld [vmem:[%s165_s23] sm:$0xff]  ;;  %v173_v34 = vld [vmem:[%s165_s23 + $0x8] sm:$0xff]  ;;  %v174_v35 = vld [vmem:[%s165_s23 + $0x10] sm:$0x3]  ;;  %v248_v6 = vshrl.u32 %v247_v5, 7 }
  0x12   : > { %545 = vmatpush1.bf16.msra.mxu0 %v771_v18  ;;  %v179_v36 = vrot.slane %v172_v33, 1  ;;  %v180_v37 = vrot.slane %v173_v34, 1  ;;  %v182_v38 = vrot.slane %v174_v35, 1  ;;  %v795_v39 = vld [vmem:[%s1005_s1 + $0x160] ss:$8 sps:$4 sm:$0xff]   ;;  %v190_v40 = vrot.slane %v174_v35, 2 }
  0x13   : > { %504 = vmatpush1.bf16.msra.mxu1 %v742_v8  ;;  %546 = vmatprep.subr.bf16.mxu0 %v773_v19  ;;  %v187_v41 = vrot.slane %v172_v33, 2  ;;  %v188_v42 = vrot.slane %v173_v34, 2  ;;  %v766_v43 = vld [vmem:[%s1005_s1 + $0x90] ss:$8 sps:$4 sm:$0xff]   ;;  %v797_v44 = vld [vmem:[%s1005_s1 + $0x174] ss:$8 sps:$4 sm:$0xff]   ;;  %v194_v0 = vpack.c.bf16 %v173_v34, %v172_v33 }
  0x14   : > { %505 = vmatprep.subr.bf16.mxu1 %v743_v10  ;;  %v181_v45 = vsel %vm178_vm0, %v179_v36, %v180_v37  ;;  %v183_v46 = vsel %vm178_vm0, %v180_v37, %v182_v38  ;;  %v769_v47 = vld [vmem:[%s1005_s1 + $0xa4] ss:$8 sps:$4 sm:$0xff]   ;;  %v801_v49 = vld [vmem:[%s1005_s1 + $0x170] ss:$8 sps:$4 sm:$0xff]   ;;  %v772_v52 = vld [vmem:[%s1005_s1 + $0xa0] ss:$8 sps:$4 sm:$0xff]  }
  0x15   : > { %v195_v48 = vpack.c.bf16 %v183_v46, %v181_v45  ;;  %v189_v50 = vsel %vm186_vm1, %v187_v41, %v188_v42  ;;  %v191_v51 = vsel %vm186_vm1, %v188_v42, %v190_v40  ;;  %v775_v53 = vld [vmem:[%s1005_s1 + $0xb4] ss:$8 sps:$4 sm:$0xff]   ;;  %v778_v55 = vld [vmem:[%s1005_s1 + $0xb0] ss:$8 sps:$4 sm:$0xff]   ;;  %v781_v56 = vld [vmem:[%s1005_s1 + $0xc4] ss:$8 sps:$4 sm:$0xff]  }
  0x16   : > { %547 = vmatpush1.bf16.msra.mxu0 %v777_v21  ;;  %v196_v54 = vpack.c.bf16 %v191_v51, %v189_v50  ;;  %v784_v57 = vld [vmem:[%s1005_s1 + $0xc0] ss:$8 sps:$4 sm:$0xff]   ;;  %v787_v58 = vld [vmem:[%s1005_s1 + $0xd4] ss:$8 sps:$4 sm:$0xff]   ;;  %v790_v59 = vld [vmem:[%s1005_s1 + $0xd0] ss:$8 sps:$4 sm:$0xff]  }
  0x17   : > { %506 = vmatpush1.bf16.msra.mxu1 %v745_v13  ;;  %548 = vmatprep.subr.bf16.mxu0 %v779_v23  ;;  %v793_v60 = vld [vmem:[%s1005_s1 + $0xe4] ss:$8 sps:$4 sm:$0xff]   ;;  %v796_v61 = vld [vmem:[%s1005_s1 + $0xe0] ss:$8 sps:$4 sm:$0xff]   ;;  %v799_v62 = vld [vmem:[%s1005_s1 + $0xf4] ss:$8 sps:$4 sm:$0xff]  }
  0x18   : > { %507 = vmatprep.subr.bf16.mxu1 %v746_v14  ;;  %529 = vmatprep.mubr.bf16.mxu1 %v195_v48  ;;  %v802_v63 = vld [vmem:[%s1005_s1 + $0xf0] ss:$8 sps:$4 sm:$0xff]   ;;  %v249_v7 = vsub.s32 0, %v248_v6  ;;  %v245_v8 = vld [vmem:[%s1006_s2] sm:$0x3]  ;;  %v253_v9 = vsub.s32 1, %v248_v6 }
  0x1a   : > { %549 = vmatpush1.bf16.msra.mxu0 %v783_v26  ;;  %v250_v10 = vrot.slane %v245_v8, %v249_v7  ;;  %v254_v11 = vrot.slane %v245_v8, %v253_v9 }
  0x1b   : > { %508 = vmatpush1.bf16.msra.mxu1 %v748_v17  ;;  %550 = vmatprep.subr.bf16.mxu0 %v785_v27 }
  0x1c   : > { %509 = vmatprep.subr.bf16.mxu1 %v749_v20 }
  0x1e   : > { %551 = vmatpush1.bf16.msra.mxu0 %v789_v29 }
  0x1f   : > { %510 = vmatpush1.bf16.msra.mxu1 %v751_v22  ;;  %552 = vmatprep.subr.bf16.mxu0 %v791_v32 }
  0x20   : > { %511 = vmatprep.subr.bf16.mxu1 %v752_v24 }
  0x22   : > { %553 = vmatpush1.bf16.msra.mxu0 %v795_v39 }
  0x23   : > { %512 = vmatpush1.bf16.msra.mxu1 %v754_v25  ;;  %554 = vmatprep.subr.bf16.mxu0 %v797_v44 }
  0x24   : > { %513 = vmatprep.subr.bf16.mxu1 %v757_v28 }
  0x26   : > { %555 = vmatpush1.bf16.msra.mxu0 %v801_v49 }
  0x27   : > { %514 = vmatpush1.bf16.msra.mxu1 %v760_v30 }
  0x28   : > { %515 = vmatprep.subr.bf16.mxu1 %v763_v31 }
  0x29   : > { %573 = vmatmul.mubr.bf16.vlgmr.msra.gmra.mrb[0].mxu0 %v196_v54 }
  0x2b   : > { %516 = vmatpush1.bf16.msra.mxu1 %v766_v43 }
  0x2c   : > { %517 = vmatprep.subr.bf16.mxu1 %v769_v47 }
  0x2f   : > { %518 = vmatpush1.bf16.msra.mxu1 %v772_v52 }
  0x30   : > { %519 = vmatprep.subr.bf16.mxu1 %v775_v53 }
  0x33   : > { %520 = vmatpush1.bf16.msra.mxu1 %v778_v55 }
  0x34   : > { %521 = vmatprep.subr.bf16.mxu1 %v781_v56 }
  0x37   : > { %522 = vmatpush1.bf16.msra.mxu1 %v784_v57 }
  0x38   : > { %523 = vmatprep.subr.bf16.mxu1 %v787_v58 }
  0x3b   : > { %524 = vmatpush1.bf16.msra.mxu1 %v790_v59 }
  0x3c   : > { %525 = vmatprep.subr.bf16.mxu1 %v793_v60 }
  0x3f   : > { %526 = vmatpush1.bf16.msra.mxu1 %v796_v61 }
  0x40   : > { %527 = vmatprep.subr.bf16.mxu1 %v799_v62 }
  0x43   : > { %528 = vmatpush1.bf16.msra.mxu1 %v802_v63 }
  0x46   : > { %530 = vmatmul.mubr.bf16.vlgmr.msra.gmra.mrb[0].mxu1 %v194_v0 }
  0xfc   : > { %v574_v1 = vpop.f32.mrb[0].mxu0 }
  0xfd   : > { %v576_v2 = vpop.f32.mrb[1].mxu0 }
  0xfe   : > { %v578_v3 = vpop.f32.mrb[2].mxu0 }
  0xff   : > { %v580_v4 = vpop.f32.mrb[3].mxu0 }
 0x119   : > { %v531_v12 = vpop.f32.mrb[0].mxu1 }
 0x11a   : > { %v532_v13 = vadd.f32 %v531_v12, %v250_v10  ;;  %v533_v14 = vpop.f32.mrb[1].mxu1 }
 0x11b   : > { %v534_v15 = vadd.f32 %v533_v14, %v254_v11  ;;  %v535_v16 = vpop.f32.mrb[2].mxu1 }
 0x11c   : > { %v575_v17 = vadd.f32 %v574_v1, %v532_v13  ;;  %v536_v18 = vadd.f32 %v535_v16, %v250_v10  ;;  %v537_v19 = vpop.f32.mrb[3].mxu1 }
 0x11d   : > { %v577_v20 = vadd.f32 %v576_v2, %v534_v15  ;;  %v538_v21 = vadd.f32 %v537_v19, %v254_v11 }
 0x11e   : > { %vm583_vm2 = vcmp.ge.f32.partialorder %v575_v17, 0.0  ;;  %v587_v22 = vmul.f32 0.01, %v575_v17  ;;  %v579_v23 = vadd.f32 %v578_v3, %v536_v18 }
 0x11f   : > { %vm584_vm3 = vcmp.ge.f32.partialorder %v577_v20, 0.0  ;;  %v588_v24 = vmul.f32 0.01, %v577_v20  ;;  %v581_v25 = vadd.f32 %v580_v4, %v538_v21 }
 0x120   : > { %v591_v26 = vsel %vm583_vm2, %v575_v17, %v587_v22  ;;  %vm585_vm4 = vcmp.ge.f32.partialorder %v579_v23, 0.0  ;;  %v589_v27 = vmul.f32 0.01, %v579_v23 }
 0x121   : > { %v592_v28 = vsel %vm584_vm3, %v577_v20, %v588_v24  ;;  %vm586_vm5 = vcmp.ge.f32.partialorder %v581_v25, 0.0  ;;  %v590_v29 = vmul.f32 0.01, %v581_v25 }
 0x122   : > { %v595_v30 = vadd.f32 %v592_v28, %v591_v26  ;;  %v593_v31 = vsel %vm585_vm4, %v579_v23, %v589_v27 }
 0x123   : > { %v594_v32 = vsel %vm586_vm5, %v581_v25, %v590_v29 }
 0x124   : > { %597 = vst [vmem:[%s170_s19] sm:$0xff] %v595_v30  ;;  %v596_v33 = vadd.f32 %v594_v32, %v593_v31 }
 0x126   : > { %598 = vst [vmem:[%s170_s19 + $0x8] sm:$0xff] %v596_v33 }
 0x127 PF: > { %s13_s12 = sadd.s32 1, %s809_s12  }
 0x128   : > { %p10_p4 = scmp.ge.s32.totalorder %s13_s12, 4  }
 0x12a   :  { %12 = sbr.rel (!%p10_p4) target bundleno = 1 (0x1), region = 62 }

// kernel: tile.14
= control target key start
LH: loop header
LB: loop body
LE: loop exit
PB: predicated region body
PF: predicated region fallthrough
CT: control target
= control target key end

     0   :  { %s28_s0 = inlined_call_operand.vmem [shape: f32[8], index: 0, kind: input, shape index: {}]   ;;  %s29_s1 = inlined_call_operand.vmem [shape: f32[16,8], index: 1, kind: output, shape index: {}]  }
   0x1   :  { %v4_v0 = vld [vmem:[%s28_s0] ss:$0 sm:$0xff] }
   0x2   :  { %5 = vst [vmem:[%s29_s1] sm:$0xff] %v4_v0  ;;  %8 = vst [vmem:[%s29_s1 + $0x8] sm:$0xff] %v4_v0 }

// kernel: tile.15
= control target key start
LH: loop header
LB: loop body
LE: loop exit
PB: predicated region body
PF: predicated region fallthrough
CT: control target
= control target key end

     0   :  { %s131_s10 = smov 120   ;;  %s132_s11 = smov 104   ;;  %vm3_vm0 = vcmask 64512   ;;  %vm9_vm1 = vcmask 1048512   ;;  %vm15_vm2 = vcmask 982912   ;;  %vm21_vm3 = vcmask 917312   ;;  %s207_s0 = inlined_call_operand.vmem [shape: f32[16,8], index: 0, kind: input, shape index: {}]   ;;  %s208_s1 = inlined_call_operand.vmem [shape: f32[128], index: 1, kind: output, shape index: {}]  }
   0x1   :  { %v101_v0 = vld [vmem:[%s207_s0 + $0xf] sm:$0x1]   ;;  %v103_v1 = vld [vmem:[%s207_s0 + $0xd] sm:$0x1]   ;;  %v102_v2 = vld [vmem:[%s207_s0 + $0xe] sm:$0x1]  }
   0x2   :  { %7 = vrot.lane.b32.xlu0 %v101_v0, %s131_s10  ;;  %19 = vrot.lane.b32.xlu1 %v103_v1, %s132_s11  ;;  %v104_v3 = vld [vmem:[%s207_s0 + $0xc] sm:$0x1]   ;;  %s133_s16 = smov 112   ;;  %s134_s17 = smov 96   ;;  %v105_v4 = vld [vmem:[%s207_s0 + $0xb] sm:$0x1]  }
   0x3   :  { %v106_v5 = vld [vmem:[%s207_s0 + $0xa] sm:$0x1]   ;;  %v2_v6 = vld [vmem:[%s207_s0] sm:$0x1]   ;;  %s135_s24 = smov 88   ;;  %s136_s25 = smov 80  }
   0x4   :  { %4 = vst.msk [vmem:[#allocation0] sm:$0x1] %vm3_vm0, %v2_v6   ;;  %v107_v7 = vld [vmem:[%s207_s0 + $0x9] sm:$0x1]   ;;  %v108_v8 = vld [vmem:[%s207_s0 + $0x8] sm:$0x1]  }
   0x5   :  { %s137_s30 = smov 72   ;;  %s138_s2 = smov 64   ;;  %v109_v9 = vld [vmem:[%s207_s0 + $0x7] sm:$0x1]   ;;  %v110_v10 = vld [vmem:[%s207_s0 + $0x6] sm:$0x1]  }
   0x6   :  { %13 = vrot.lane.b32.xlu0 %v102_v2, %s133_s16  ;;  %25 = vrot.lane.b32.xlu1 %v104_v3, %s134_s17  ;;  %s139_s7 = smov 56   ;;  %s140_s8 = smov 48   ;;  %v111_v11 = vld [vmem:[%s207_s0 + $0x5] sm:$0x1]   ;;  %v112_v12 = vld [vmem:[%s207_s0 + $0x4] sm:$0x1]  }
   0x7   :  { %s141_s13 = smov 40   ;;  %s142_s14 = smov 32   ;;  %v113_v13 = vld [vmem:[%s207_s0 + $0x3] sm:$0x1]   ;;  %v114_v14 = vld [vmem:[%s207_s0 + $0x2] sm:$0x1]  }
   0x8   :  { %s143_s19 = smov 24   ;;  %s144_s20 = smov 16   ;;  %v115_v15 = vld [vmem:[%s207_s0 + $0x1] sm:$0x1]   ;;  %vm27_vm4 = vcmask 851712   ;;  %vm33_vm5 = vcmask 786112  }
   0x9   :  { %s145_s0 = smov 8   ;;  %vm39_vm6 = vcmask 720512   ;;  %vm45_vm7 = vcmask 654912   ;;  %vm51_vm8 = vcmask 589312   ;;  %vm57_vm9 = vcmask 523712  }
   0xa   :  { %31 = vrot.lane.b32.xlu0 %v105_v4, %s135_s24  ;;  %37 = vrot.lane.b32.xlu1 %v106_v5, %s136_s25  ;;  %vm63_vm10 = vcmask 458112   ;;  %vm69_vm11 = vcmask 392512   ;;  %vm75_vm12 = vcmask 326912   ;;  %vm81_vm13 = vcmask 261312  }
   0xb   :  { %vm87_vm14 = vcmask 195712   ;;  %vm93_vm15 = vcmask 130112  }
   0xe   :  { %43 = vrot.lane.b32.xlu0 %v107_v7, %s137_s30  ;;  %49 = vrot.lane.b32.xlu1 %v108_v8, %s138_s2 }
  0x12   :  { %55 = vrot.lane.b32.xlu0 %v109_v9, %s139_s7  ;;  %61 = vrot.lane.b32.xlu1 %v110_v10, %s140_s8 }
  0x16   :  { %67 = vrot.lane.b32.xlu0 %v111_v11, %s141_s13  ;;  %73 = vrot.lane.b32.xlu1 %v112_v12, %s142_s14 }
  0x1a   :  { %79 = vrot.lane.b32.xlu0 %v113_v13, %s143_s19  ;;  %85 = vrot.lane.b32.xlu1 %v114_v14, %s144_s20 }
  0x1e   :  { %91 = vrot.lane.b32.xlu0 %v115_v15, %s145_s0 }
  0x74   :  { %v8_v16 = vpop.permute.xlu0 %7   ;;  %v20_v17 = vpop.permute.xlu1 %19  }
  0x75   :  { %10 = vst.msk [vmem:[#allocation0] sm:$0x1] %vm9_vm1, %v8_v16  }
  0x78   :  { %v14_v18 = vpop.permute.xlu0 %13   ;;  %v26_v19 = vpop.permute.xlu1 %25  }
  0x79   :  { %16 = vst.msk [vmem:[#allocation0] sm:$0x1] %vm15_vm2, %v14_v18  }
  0x7a   :  { %22 = vst.msk [vmem:[#allocation0] sm:$0x1] %vm21_vm3, %v20_v17  }
  0x7b   :  { %28 = vst.msk [vmem:[#allocation0] sm:$0x1] %vm27_vm4, %v26_v19  }
  0x7c   :  { %v32_v20 = vpop.permute.xlu0 %31   ;;  %v38_v21 = vpop.permute.xlu1 %37  }
  0x7d   :  { %34 = vst.msk [vmem:[#allocation0] sm:$0x1] %vm33_vm5, %v32_v20  }
  0x7e   :  { %40 = vst.msk [vmem:[#allocation0] sm:$0x1] %vm39_vm6, %v38_v21  }
  0x80   :  { %v44_v22 = vpop.permute.xlu0 %43   ;;  %v50_v23 = vpop.permute.xlu1 %49  }
  0x81   :  { %46 = vst.msk [vmem:[#allocation0] sm:$0x1] %vm45_vm7, %v44_v22  }
  0x82   :  { %52 = vst.msk [vmem:[#allocation0] sm:$0x1] %vm51_vm8, %v50_v23  }
  0x84   :  { %v56_v24 = vpop.permute.xlu0 %55   ;;  %v62_v25 = vpop.permute.xlu1 %61  }
  0x85   :  { %58 = vst.msk [vmem:[#allocation0] sm:$0x1] %vm57_vm9, %v56_v24  }
  0x86   :  { %64 = vst.msk [vmem:[#allocation0] sm:$0x1] %vm63_vm10, %v62_v25  }
  0x88   :  { %v68_v26 = vpop.permute.xlu0 %67   ;;  %v74_v27 = vpop.permute.xlu1 %73  }
  0x89   :  { %70 = vst.msk [vmem:[#allocation0] sm:$0x1] %vm69_vm11, %v68_v26  }
  0x8a   :  { %76 = vst.msk [vmem:[#allocation0] sm:$0x1] %vm75_vm12, %v74_v27  }
  0x8c   :  { %v80_v28 = vpop.permute.xlu0 %79   ;;  %v86_v29 = vpop.permute.xlu1 %85  }
  0x8d   :  { %82 = vst.msk [vmem:[#allocation0] sm:$0x1] %vm81_vm13, %v80_v28  }
  0x8e   :  { %88 = vst.msk [vmem:[#allocation0] sm:$0x1] %vm87_vm14, %v86_v29  }
  0x90   :  { %v92_v30 = vpop.permute.xlu0 %91  }
  0x91   :  { %94 = vst.msk [vmem:[#allocation0] sm:$0x1] %vm93_vm15, %v92_v30  }
  0x98   :  { %v98_v31 = vld [vmem:[#allocation0] sm:$0x1] }
  0x99   :  { %100 = vst [vmem:[%s208_s1] sm:$0x1] %v98_v31 }

// kernel: res_block_pallas.1
= control target key start
LH: loop header
LB: loop body
LE: loop exit
PB: predicated region body
PF: predicated region fallthrough
CT: control target
= control target key end

     0   :  { %s832_s12 = smov 0   ;;  %s1004_s0 = inlined_call_operand.vmem [shape: f32[2,18,128], index: 0, kind: input, shape index: {}]   ;;  %s1005_s1 = inlined_call_operand.vmem [shape: bf16[384,256], index: 1, kind: input, shape index: {}]   ;;  %s1006_s2 = inlined_call_operand.vmem [shape: f32[1,256], index: 2, kind: input, shape index: {}]   ;;  %s1007_s3 = inlined_call_operand.vmem [shape: f32[2,16,128], index: 3, kind: output, shape index: {}]  }
   0x1 LB: > { %s654_s13 = sadd.s32 4294967295, %s809_s12   ;;  %p658_p0 = scmp.ge.s32.totalorder %s809_s12, 1  ;;  %s809_s12 = sphi %s832_s12, %s13_s12  }
   0x2   : > { %p137_p1 = scmp.lt.s32.totalorder %s809_s12, 3 }
   0x4   : > { %p138_p2 = pnand %p658_p0, %p137_p1 }
   0x5   : > { %v731_v0 = vld [vmem:[%s1005_s1 + $0x4] ss:$8 sps:$4 sm:$0xff] (!%p138_p2)   ;;  %v733_v1 = vld [vmem:[%s1005_s1] ss:$8 sps:$4 sm:$0xff] (!%p138_p2)   ;;  %v811_v2 = vmov (!%p138_p2), 0   ;;  %p161_p3 = scmp.lt.s32.totalorder (!%p138_p2), %s654_s13, 1 }
   0x6   : > { %141 = sbr.rel (%p138_p2) target bundleno = 295 (0x127), region = 32  ;;  %572 = vmatprep.mubr.bf16.mxu0 (!%p138_p2), %v811_v2  ;;  %497 = vmatprep.subr.bf16.mxu1 (!%p138_p2), %v731_v0  ;;  %v734_v3 = vld [vmem:[%s1005_s1 + $0x14] ss:$8 sps:$4 sm:$0xff] (!%p138_p2)   ;;  %v736_v4 = vld [vmem:[%s1005_s1 + $0x10] ss:$8 sps:$4 sm:$0xff] (!%p138_p2)   ;;  %vm178_vm0 = vcmask (!%p138_p2), 1046528  }
   0x7   : > { %498 = vmatpush1.bf16.msra.mxu1 (!%p138_p2), %v733_v1  ;;  %v737_v5 = vld [vmem:[%s1005_s1 + $0x24] ss:$8 sps:$4 sm:$0xff] (!%p138_p2)   ;;  %v739_v6 = vld [vmem:[%s1005_s1 + $0x20] ss:$8 sps:$4 sm:$0xff] (!%p138_p2)   ;;  %v740_v7 = vld [vmem:[%s1005_s1 + $0x34] ss:$8 sps:$4 sm:$0xff] (!%p138_p2)  }
   0x8   : > { %499 = vmatprep.subr.bf16.mxu1 (!%p138_p2), %v734_v3  ;;  %v742_v8 = vld [vmem:[%s1005_s1 + $0x30] ss:$8 sps:$4 sm:$0xff] (!%p138_p2)   ;;  %v755_v9 = vld [vmem:[%s1005_s1 + $0x104] ss:$8 sps:$4 sm:$0xff] (!%p138_p2)   ;;  %v759_v11 = vld [vmem:[%s1005_s1 + $0x100] ss:$8 sps:$4 sm:$0xff] (!%p138_p2)  }
   0x9   : > { %v743_v10 = vld [vmem:[%s1005_s1 + $0x44] ss:$8 sps:$4 sm:$0xff] (!%p138_p2)   ;;  %540 = vmatprep.subr.bf16.mxu0 (!%p138_p2), %v755_v9  ;;  %v761_v12 = vld [vmem:[%s1005_s1 + $0x114] ss:$8 sps:$4 sm:$0xff] (!%p138_p2)   ;;  %v745_v13 = vld [vmem:[%s1005_s1 + $0x40] ss:$8 sps:$4 sm:$0xff] (!%p138_p2)  }
   0xa   : > { %541 = vmatpush1.bf16.msra.mxu0 (!%p138_p2), %v759_v11  ;;  %v746_v14 = vld [vmem:[%s1005_s1 + $0x54] ss:$8 sps:$4 sm:$0xff] (!%p138_p2)   ;;  %v765_v15 = vld [vmem:[%s1005_s1 + $0x110] ss:$8 sps:$4 sm:$0xff] (!%p138_p2)   ;;  %v767_v16 = vld [vmem:[%s1005_s1 + $0x124] ss:$8 sps:$4 sm:$0xff] (!%p138_p2)  }
   0xb   : > { %500 = vmatpush1.bf16.msra.mxu1 (!%p138_p2), %v736_v4  ;;  %542 = vmatprep.subr.bf16.mxu0 (!%p138_p2), %v761_v12  ;;  %v748_v17 = vld [vmem:[%s1005_s1 + $0x50] ss:$8 sps:$4 sm:$0xff] (!%p138_p2)   ;;  %v771_v18 = vld [vmem:[%s1005_s1 + $0x120] ss:$8 sps:$4 sm:$0xff] (!%p138_p2)   ;;  %v773_v19 = vld [vmem:[%s1005_s1 + $0x134] ss:$8 sps:$4 sm:$0xff] (!%p138_p2)  }
   0xc   : > { %501 = vmatprep.subr.bf16.mxu1 (!%p138_p2), %v737_v5  ;;  %v749_v20 = vld [vmem:[%s1005_s1 + $0x64] ss:$8 sps:$4 sm:$0xff] (!%p138_p2)   ;;  %v777_v21 = vld [vmem:[%s1005_s1 + $0x130] ss:$8 sps:$4 sm:$0xff] (!%p138_p2)   ;;  %v751_v22 = vld [vmem:[%s1005_s1 + $0x60] ss:$8 sps:$4 sm:$0xff] (!%p138_p2)   ;;  %v247_v5 = vlaneseq (!%p138_p2) }
   0xd   : > { %s1009_s13 = smov (!%p161_p3, %s654_s13), 1  ;;  %v779_v23 = vld [vmem:[%s1005_s1 + $0x144] ss:$8 sps:$4 sm:$0xff]   ;;  %v752_v24 = vld [vmem:[%s1005_s1 + $0x74] ss:$8 sps:$4 sm:$0xff]   ;;  %vm186_vm1 = vcmask 1045504  }
   0xe   : > { %543 = vmatpush1.bf16.msra.mxu0 %v765_v15  ;;  %s721_s10 = smul.u32 24, %s1009_s13  ;;  %v754_v25 = vld [vmem:[%s1005_s1 + $0x70] ss:$8 sps:$4 sm:$0xff]   ;;  %v783_v26 = vld [vmem:[%s1005_s1 + $0x140] ss:$8 sps:$4 sm:$0xff]   ;;  %s712_s16 = sshll.u32 %s1009_s13, 4 }
   0xf   : > { %502 = vmatpush1.bf16.msra.mxu1 %v739_v6  ;;  %544 = vmatprep.subr.bf16.mxu0 %v767_v16  ;;  %v785_v27 = vld [vmem:[%s1005_s1 + $0x154] ss:$8 sps:$4 sm:$0xff]   ;;  %v757_v28 = vld [vmem:[%s1005_s1 + $0x84] ss:$8 sps:$4 sm:$0xff]   ;;  %v789_v29 = vld [vmem:[%s1005_s1 + $0x150] ss:$8 sps:$4 sm:$0xff]   ;;  %s170_s19 = scalar_lea.vmem %s1007_s3, %s712_s16 }
  0x10   : > { %503 = vmatprep.subr.bf16.mxu1 %v740_v7  ;;  %s165_s23 = scalar_lea.vmem %s1004_s0, %s721_s10  ;;  %v760_v30 = vld [vmem:[%s1005_s1 + $0x80] ss:$8 sps:$4 sm:$0xff]   ;;  %v763_v31 = vld [vmem:[%s1005_s1 + $0x94] ss:$8 sps:$4 sm:$0xff]   ;;  %v791_v32 = vld [vmem:[%s1005_s1 + $0x164] ss:$8 sps:$4 sm:$0xff]  }
  0x11   : > { %v172_v33 = vld [vmem:[%s165_s23] sm:$0xff]  ;;  %v173_v34 = vld [vmem:[%s165_s23 + $0x8] sm:$0xff]  ;;  %v174_v35 = vld [vmem:[%s165_s23 + $0x10] sm:$0x3]  ;;  %v248_v6 = vshrl.u32 %v247_v5, 7 }
  0x12   : > { %545 = vmatpush1.bf16.msra.mxu0 %v771_v18  ;;  %v179_v36 = vrot.slane %v172_v33, 1  ;;  %v180_v37 = vrot.slane %v173_v34, 1  ;;  %v182_v38 = vrot.slane %v174_v35, 1  ;;  %v795_v39 = vld [vmem:[%s1005_s1 + $0x160] ss:$8 sps:$4 sm:$0xff]   ;;  %v190_v40 = vrot.slane %v174_v35, 2 }
  0x13   : > { %504 = vmatpush1.bf16.msra.mxu1 %v742_v8  ;;  %546 = vmatprep.subr.bf16.mxu0 %v773_v19  ;;  %v187_v41 = vrot.slane %v172_v33, 2  ;;  %v188_v42 = vrot.slane %v173_v34, 2  ;;  %v766_v43 = vld [vmem:[%s1005_s1 + $0x90] ss:$8 sps:$4 sm:$0xff]   ;;  %v797_v44 = vld [vmem:[%s1005_s1 + $0x174] ss:$8 sps:$4 sm:$0xff]   ;;  %v194_v0 = vpack.c.bf16 %v173_v34, %v172_v33 }
  0x14   : > { %505 = vmatprep.subr.bf16.mxu1 %v743_v10  ;;  %v181_v45 = vsel %vm178_vm0, %v179_v36, %v180_v37  ;;  %v183_v46 = vsel %vm178_vm0, %v180_v37, %v182_v38  ;;  %v769_v47 = vld [vmem:[%s1005_s1 + $0xa4] ss:$8 sps:$4 sm:$0xff]   ;;  %v801_v49 = vld [vmem:[%s1005_s1 + $0x170] ss:$8 sps:$4 sm:$0xff]   ;;  %v772_v52 = vld [vmem:[%s1005_s1 + $0xa0] ss:$8 sps:$4 sm:$0xff]  }
  0x15   : > { %v195_v48 = vpack.c.bf16 %v183_v46, %v181_v45  ;;  %v189_v50 = vsel %vm186_vm1, %v187_v41, %v188_v42  ;;  %v191_v51 = vsel %vm186_vm1, %v188_v42, %v190_v40  ;;  %v775_v53 = vld [vmem:[%s1005_s1 + $0xb4] ss:$8 sps:$4 sm:$0xff]   ;;  %v778_v55 = vld [vmem:[%s1005_s1 + $0xb0] ss:$8 sps:$4 sm:$0xff]   ;;  %v781_v56 = vld [vmem:[%s1005_s1 + $0xc4] ss:$8 sps:$4 sm:$0xff]  }
  0x16   : > { %547 = vmatpush1.bf16.msra.mxu0 %v777_v21  ;;  %v196_v54 = vpack.c.bf16 %v191_v51, %v189_v50  ;;  %v784_v57 = vld [vmem:[%s1005_s1 + $0xc0] ss:$8 sps:$4 sm:$0xff]   ;;  %v787_v58 = vld [vmem:[%s1005_s1 + $0xd4] ss:$8 sps:$4 sm:$0xff]   ;;  %v790_v59 = vld [vmem:[%s1005_s1 + $0xd0] ss:$8 sps:$4 sm:$0xff]  }
  0x17   : > { %506 = vmatpush1.bf16.msra.mxu1 %v745_v13  ;;  %548 = vmatprep.subr.bf16.mxu0 %v779_v23  ;;  %v793_v60 = vld [vmem:[%s1005_s1 + $0xe4] ss:$8 sps:$4 sm:$0xff]   ;;  %v796_v61 = vld [vmem:[%s1005_s1 + $0xe0] ss:$8 sps:$4 sm:$0xff]   ;;  %v799_v62 = vld [vmem:[%s1005_s1 + $0xf4] ss:$8 sps:$4 sm:$0xff]  }
  0x18   : > { %507 = vmatprep.subr.bf16.mxu1 %v746_v14  ;;  %529 = vmatprep.mubr.bf16.mxu1 %v195_v48  ;;  %v802_v63 = vld [vmem:[%s1005_s1 + $0xf0] ss:$8 sps:$4 sm:$0xff]   ;;  %v249_v7 = vsub.s32 0, %v248_v6  ;;  %v245_v8 = vld [vmem:[%s1006_s2] sm:$0x3]  ;;  %v253_v9 = vsub.s32 1, %v248_v6 }
  0x1a   : > { %549 = vmatpush1.bf16.msra.mxu0 %v783_v26  ;;  %v250_v10 = vrot.slane %v245_v8, %v249_v7  ;;  %v254_v11 = vrot.slane %v245_v8, %v253_v9 }
  0x1b   : > { %508 = vmatpush1.bf16.msra.mxu1 %v748_v17  ;;  %550 = vmatprep.subr.bf16.mxu0 %v785_v27 }
  0x1c   : > { %509 = vmatprep.subr.bf16.mxu1 %v749_v20 }
  0x1e   : > { %551 = vmatpush1.bf16.msra.mxu0 %v789_v29 }
  0x1f   : > { %510 = vmatpush1.bf16.msra.mxu1 %v751_v22  ;;  %552 = vmatprep.subr.bf16.mxu0 %v791_v32 }
  0x20   : > { %511 = vmatprep.subr.bf16.mxu1 %v752_v24 }
  0x22   : > { %553 = vmatpush1.bf16.msra.mxu0 %v795_v39 }
  0x23   : > { %512 = vmatpush1.bf16.msra.mxu1 %v754_v25  ;;  %554 = vmatprep.subr.bf16.mxu0 %v797_v44 }
  0x24   : > { %513 = vmatprep.subr.bf16.mxu1 %v757_v28 }
  0x26   : > { %555 = vmatpush1.bf16.msra.mxu0 %v801_v49 }
  0x27   : > { %514 = vmatpush1.bf16.msra.mxu1 %v760_v30 }
  0x28   : > { %515 = vmatprep.subr.bf16.mxu1 %v763_v31 }
  0x29   : > { %573 = vmatmul.mubr.bf16.vlgmr.msra.gmra.mrb[0].mxu0 %v196_v54 }
  0x2b   : > { %516 = vmatpush1.bf16.msra.mxu1 %v766_v43 }
  0x2c   : > { %517 = vmatprep.subr.bf16.mxu1 %v769_v47 }
  0x2f   : > { %518 = vmatpush1.bf16.msra.mxu1 %v772_v52 }
  0x30   : > { %519 = vmatprep.subr.bf16.mxu1 %v775_v53 }
  0x33   : > { %520 = vmatpush1.bf16.msra.mxu1 %v778_v55 }
  0x34   : > { %521 = vmatprep.subr.bf16.mxu1 %v781_v56 }
  0x37   : > { %522 = vmatpush1.bf16.msra.mxu1 %v784_v57 }
  0x38   : > { %523 = vmatprep.subr.bf16.mxu1 %v787_v58 }
  0x3b   : > { %524 = vmatpush1.bf16.msra.mxu1 %v790_v59 }
  0x3c   : > { %525 = vmatprep.subr.bf16.mxu1 %v793_v60 }
  0x3f   : > { %526 = vmatpush1.bf16.msra.mxu1 %v796_v61 }
  0x40   : > { %527 = vmatprep.subr.bf16.mxu1 %v799_v62 }
  0x43   : > { %528 = vmatpush1.bf16.msra.mxu1 %v802_v63 }
  0x46   : > { %530 = vmatmul.mubr.bf16.vlgmr.msra.gmra.mrb[0].mxu1 %v194_v0 }
  0xfc   : > { %v574_v1 = vpop.f32.mrb[0].mxu0 }
  0xfd   : > { %v576_v2 = vpop.f32.mrb[1].mxu0 }
  0xfe   : > { %v578_v3 = vpop.f32.mrb[2].mxu0 }
  0xff   : > { %v580_v4 = vpop.f32.mrb[3].mxu0 }
 0x119   : > { %v531_v12 = vpop.f32.mrb[0].mxu1 }
 0x11a   : > { %v532_v13 = vadd.f32 %v531_v12, %v250_v10  ;;  %v533_v14 = vpop.f32.mrb[1].mxu1 }
 0x11b   : > { %v534_v15 = vadd.f32 %v533_v14, %v254_v11  ;;  %v535_v16 = vpop.f32.mrb[2].mxu1 }
 0x11c   : > { %v575_v17 = vadd.f32 %v574_v1, %v532_v13  ;;  %v536_v18 = vadd.f32 %v535_v16, %v250_v10  ;;  %v537_v19 = vpop.f32.mrb[3].mxu1 }
 0x11d   : > { %v577_v20 = vadd.f32 %v576_v2, %v534_v15  ;;  %v538_v21 = vadd.f32 %v537_v19, %v254_v11 }
 0x11e   : > { %vm583_vm2 = vcmp.ge.f32.partialorder %v575_v17, 0.0  ;;  %v587_v22 = vmul.f32 0.01, %v575_v17  ;;  %v579_v23 = vadd.f32 %v578_v3, %v536_v18 }
 0x11f   : > { %vm584_vm3 = vcmp.ge.f32.partialorder %v577_v20, 0.0  ;;  %v588_v24 = vmul.f32 0.01, %v577_v20  ;;  %v581_v25 = vadd.f32 %v580_v4, %v538_v21 }
 0x120   : > { %v591_v26 = vsel %vm583_vm2, %v575_v17, %v587_v22  ;;  %vm585_vm4 = vcmp.ge.f32.partialorder %v579_v23, 0.0  ;;  %v589_v27 = vmul.f32 0.01, %v579_v23 }
 0x121   : > { %v592_v28 = vsel %vm584_vm3, %v577_v20, %v588_v24  ;;  %vm586_vm5 = vcmp.ge.f32.partialorder %v581_v25, 0.0  ;;  %v590_v29 = vmul.f32 0.01, %v581_v25 }
 0x122   : > { %v595_v30 = vadd.f32 %v592_v28, %v591_v26  ;;  %v593_v31 = vsel %vm585_vm4, %v579_v23, %v589_v27 }
 0x123   : > { %v594_v32 = vsel %vm586_vm5, %v581_v25, %v590_v29 }
 0x124   : > { %597 = vst [vmem:[%s170_s19] sm:$0xff] %v595_v30  ;;  %v596_v33 = vadd.f32 %v594_v32, %v593_v31 }
 0x126   : > { %598 = vst [vmem:[%s170_s19 + $0x8] sm:$0xff] %v596_v33 }
 0x127 PF: > { %s13_s12 = sadd.s32 1, %s809_s12  }
 0x128   : > { %p10_p4 = scmp.ge.s32.totalorder %s13_s12, 4  }
 0x12a   :  { %12 = sbr.rel (!%p10_p4) target bundleno = 1 (0x1), region = 62 }

</bundles_post_ra>
